<compile_context>
chip_gen: v5e
topology: v5e:2x2
jax: 0.10.0
libtpu: 0.0.40
codegen_flags: <defaults>
</compile_context>

<pallas_src>
import functools

import jax
import jax.numpy as jnp
from jax.experimental import pallas as pl
from jax.experimental.pallas import tpu as pltpu


def _round_up(x: int, m: int) -> int:
    return ((x + m - 1) // m) * m


def _twonn_kernel(x_ref, w1_ref, b1_ref, w2_ref, b2_ref, w3_ref, b3_ref, o_ref):
    # x arrives as f32; cast to bf16 on the VPU just before the MXU (free in
    # this HBM-bound regime, avoids a padded bf16 HBM round trip for x).
    x = x_ref[...].astype(jnp.bfloat16)
    # fc1 + ReLU (bf16 operands, f32 accumulate, f32 bias)
    h1 = jnp.dot(x, w1_ref[...], preferred_element_type=jnp.float32)
    h1 = jnp.maximum(h1 + b1_ref[...], 0.0).astype(jnp.bfloat16)
    # fc2 + ReLU
    h2 = jnp.dot(h1, w2_ref[...], preferred_element_type=jnp.float32)
    h2 = jnp.maximum(h2 + b2_ref[...], 0.0).astype(jnp.bfloat16)
    # fc3 (no activation)
    out = jnp.dot(h2, w3_ref[...], preferred_element_type=jnp.float32) + b3_ref[...]
    o_ref[...] = out.astype(o_ref.dtype)


def prepare_twonn_params(w1, b1, w2, b2, w3, b3):
    """One-time parameter prep: zero-pad hidden/class dims to multiples of 128
    and cast weights to bf16.  Call once; reuse the result for every forward
    call (hoists the pad+convert off the per-call path)."""
    in_features, num_hiddens = w1.shape
    num_classes = w3.shape[1]
    hid_pad = _round_up(num_hiddens, 128)
    cls_pad = _round_up(num_classes, 128)

    pad2 = lambda a, r, c: jnp.pad(a, ((0, r - a.shape[0]), (0, c - a.shape[1])))
    pad1 = lambda a, c: jnp.pad(a, ((0, c - a.shape[0]),)).reshape(1, c)

    w1b = pad2(w1, in_features, hid_pad).astype(jnp.bfloat16)
    w2b = pad2(w2, hid_pad, hid_pad).astype(jnp.bfloat16)
    w3b = pad2(w3, hid_pad, cls_pad).astype(jnp.bfloat16)
    b1p = pad1(b1.astype(jnp.float32), hid_pad)
    b2p = pad1(b2.astype(jnp.float32), hid_pad)
    b3p = pad1(b3.astype(jnp.float32), cls_pad)
    return w1b, b1p, w2b, b2p, w3b, b3p


def _choose_tile_n(n: int) -> int:
    """Batch tile: lane-/sublane-legal, >=2 grid steps when n > 256 (dual-TC
    on v7x), multiples of 256 for big batches, small padding waste."""
    if n <= 256:
        return n                                  # single full-batch block
    if n < 512:
        return _round_up(pl.cdiv(n, 2), 8)        # two ~equal blocks
    for tile in (1024, 512, 256):
        if n >= 2 * tile:
            return tile
    return 256


@functools.partial(jax.jit, static_argnames=("num_classes",))
def twonn_forward(x, w1b, b1p, w2b, b2p, w3b, b3p, *, num_classes):
    """x: (N, in_features) or (N, C, H, W) float32; params from
    prepare_twonn_params (weights are (in, out) so the kernel computes
    x @ W + b, identical to torch's x @ W_torch.T + b)."""
    if x.ndim == 4:
        x = x.reshape(x.shape[0], -1)             # same as torch .view(N, -1)
    n, in_features = x.shape
    assert w1b.shape[0] == in_features
    hid_pad = w1b.shape[1]
    cls_pad = w3b.shape[1]
    out_dtype = x.dtype

    tile_n = _choose_tile_n(n)
    # Shrink the batch tile if the double-buffered x/out tiles alone would blow
    # the VMEM budget (only triggers for very wide in_features).
    while tile_n > 256 and 2 * tile_n * (in_features + cls_pad) * 4 > 32 * 2**20:
        tile_n //= 2
    grid = (pl.cdiv(n, tile_n),)

    # VMEM budget: (double-buffered) weights/biases + x/out tiles + slack,
    # capped at 48 MiB so it leaves headroom on v7x's 64 MiB per-TC VMEM.
    w_bytes = (w1b.size + w2b.size + w3b.size) * 2 \
        + (b1p.size + b2p.size + b3p.size) * 4
    x_tile_bytes = tile_n * in_features * 4
    o_tile_bytes = tile_n * cls_pad * 4
    needed = 2 * (w_bytes + x_tile_bytes + o_tile_bytes)
    vmem_limit = int(min(48 * 2**20, max(needed + 4 * 2**20, 16 * 2**20)))

    resident = lambda shape: pl.BlockSpec(shape, lambda i: (0,) * len(shape))

    out_padded = pl.pallas_call(
        _twonn_kernel,
        out_shape=jax.ShapeDtypeStruct((n, cls_pad), out_dtype),
        grid=grid,
        in_specs=[
            # x: streamed per batch tile, f32, unpadded (full last dim).
            pl.BlockSpec((tile_n, in_features), lambda i: (i, 0)),
            resident((in_features, hid_pad)),     # w1 (bf16)
            resident((1, hid_pad)),               # b1 (f32)
            resident((hid_pad, hid_pad)),         # w2 (bf16)
            resident((1, hid_pad)),               # b2 (f32)
            resident((hid_pad, cls_pad)),         # w3 (bf16)
            resident((1, cls_pad)),               # b3 (f32)
        ],
        out_specs=pl.BlockSpec((tile_n, cls_pad), lambda i: (i, 0)),
        compiler_params=pltpu.CompilerParams(
            dimension_semantics=("parallel",),
            vmem_limit_bytes=vmem_limit,
        ),
    )(x, w1b, b1p, w2b, b2p, w3b, b3p)

    return out_padded[:, :num_classes]


def init_params(key, in_features, num_hiddens, num_classes):
    """Deterministic synthetic parameters (shapes match the nn.Linear layers)."""
    k1, k2, k3, k4, k5, k6 = jax.random.split(key, 6)
    s1 = 1.0 / jnp.sqrt(in_features)
    s2 = 1.0 / jnp.sqrt(num_hiddens)
    w1 = jax.random.uniform(k1, (in_features, num_hiddens), jnp.float32, -s1, s1)
    b1 = jax.random.uniform(k2, (num_hiddens,), jnp.float32, -s1, s1)
    w2 = jax.random.uniform(k3, (num_hiddens, num_hiddens), jnp.float32, -s2, s2)
    b2 = jax.random.uniform(k4, (num_hiddens,), jnp.float32, -s2, s2)
    w3 = jax.random.uniform(k5, (num_hiddens, num_classes), jnp.float32, -s2, s2)
    b3 = jax.random.uniform(k6, (num_classes,), jnp.float32, -s2, s2)
    return w1, b1, w2, b2, w3, b3


if __name__ == "__main__":
    key = jax.random.PRNGKey(0)
    kx, kp = jax.random.split(key)

    # Small shapes: batch=2, channels=4, spatial=16x16 -> in_features = 1024
    N, C, H, W = 2, 4, 16, 16
    in_features = C * H * W
    num_hiddens = 32
    num_classes = 10

    x = jax.random.normal(kx, (N, C, H, W), jnp.float32)
    w1, b1, w2, b2, w3, b3 = init_params(kp, in_features, num_hiddens, num_classes)

    # One-time parameter prep (padding + bf16 cast), reused across calls.
    prepared = prepare_twonn_params(w1, b1, w2, b2, w3, b3)
    prepared = jax.block_until_ready(prepared)

    out = twonn_forward(x, *prepared, num_classes=num_classes)
    out = jax.block_until_ready(out)
    assert out.shape == (N, num_classes)

    # Reference with the same bf16-operand / f32-accumulation recipe.
    xf = x.reshape(N, -1)
    bf = jnp.bfloat16
    ref = jnp.maximum(
        jnp.dot(xf.astype(bf), w1.astype(bf), preferred_element_type=jnp.float32) + b1, 0.0
    )
    ref = jnp.maximum(
        jnp.dot(ref.astype(bf), w2.astype(bf), preferred_element_type=jnp.float32) + b2, 0.0
    )
    ref = jnp.dot(ref.astype(bf), w3.astype(bf), preferred_element_type=jnp.float32) + b3
    assert jnp.allclose(out, ref, atol=2e-2, rtol=2e-2), (
        f"max abs err {jnp.max(jnp.abs(out - ref))}"
    )

    # Sanity vs full-f32 math (looser tolerance; bf16 operands lose mantissa).
    ref32 = jnp.maximum(xf @ w1 + b1, 0.0)
    ref32 = jnp.maximum(ref32 @ w2 + b2, 0.0)
    ref32 = ref32 @ w3 + b3
    assert jnp.allclose(out, ref32, atol=5e-2, rtol=5e-2)

    print("KERNEL_OK")
</pallas_src>

<mosaic_0001>
module attributes {stable_mosaic.version = 11 : i64} {
  func.func @_twonn_kernel(%arg0: i32, %arg1: memref<2x1024xf32, #tpu.memory_space<vmem>>, %arg2: memref<1024x128xbf16, #tpu.memory_space<vmem>>, %arg3: memref<1x128xf32, #tpu.memory_space<vmem>>, %arg4: memref<128x128xbf16, #tpu.memory_space<vmem>>, %arg5: memref<1x128xf32, #tpu.memory_space<vmem>>, %arg6: memref<128x128xbf16, #tpu.memory_space<vmem>>, %arg7: memref<1x128xf32, #tpu.memory_space<vmem>>, %arg8: memref<2x128xf32, #tpu.memory_space<vmem>>) attributes {dimension_semantics = [#tpu.dimension_semantics<parallel>], iteration_bounds = array<i64: 1>, scalar_prefetch = 0 : i64, scratch_operands = 0 : i64, tpu.core_type = #tpu.core_type<tc>, window_params = [{transform_indices = @transform_0, window_bounds = array<i64: 2, 1024>}, {pipeline_mode = #tpu.pipeline_mode<synchronous>, transform_indices = @transform_1, window_bounds = array<i64: 1024, 128>}, {pipeline_mode = #tpu.pipeline_mode<synchronous>, transform_indices = @transform_2, window_bounds = array<i64: 1, 128>}, {pipeline_mode = #tpu.pipeline_mode<synchronous>, transform_indices = @transform_3, window_bounds = array<i64: 128, 128>}, {pipeline_mode = #tpu.pipeline_mode<synchronous>, transform_indices = @transform_4, window_bounds = array<i64: 1, 128>}, {pipeline_mode = #tpu.pipeline_mode<synchronous>, transform_indices = @transform_5, window_bounds = array<i64: 128, 128>}, {pipeline_mode = #tpu.pipeline_mode<synchronous>, transform_indices = @transform_6, window_bounds = array<i64: 1, 128>}, {transform_indices = @transform_7, window_bounds = array<i64: 2, 128>}]} {
    %c0 = arith.constant 0 : index
    %c0_0 = arith.constant 0 : index
    %0 = vector.load %arg1[%c0, %c0_0] : memref<2x1024xf32, #tpu.memory_space<vmem>>, vector<2x1024xf32>
    %1 = arith.truncf %0 : vector<2x1024xf32> to vector<2x1024xbf16>
    %c0_1 = arith.constant 0 : index
    %c0_2 = arith.constant 0 : index
    %2 = vector.load %arg2[%c0_1, %c0_2] : memref<1024x128xbf16, #tpu.memory_space<vmem>>, vector<1024x128xbf16>
    %cst = arith.constant dense<0.000000e+00> : vector<2x128xf32>
    %3 = tpu.matmul %1, %2, %cst {dimension_numbers = #tpu.dot_dimension_numbers<[1], [0], [0], [1], [0, 0, 1, 1], [], []>} : vector<2x1024xbf16>, vector<1024x128xbf16>, vector<2x128xf32> -> vector<2x128xf32>
    %c0_3 = arith.constant 0 : index
    %c0_4 = arith.constant 0 : index
    %4 = vector.load %arg3[%c0_3, %c0_4] : memref<1x128xf32, #tpu.memory_space<vmem>>, vector<1x128xf32>
    %5 = vector.broadcast %4 : vector<1x128xf32> to vector<2x128xf32>
    %6 = arith.addf %3, %5 : vector<2x128xf32>
    %cst_5 = arith.constant 0.000000e+00 : f32
    %7 = vector.broadcast %cst_5 : f32 to vector<2x128xf32>
    %8 = arith.maximumf %6, %7 : vector<2x128xf32>
    %9 = arith.truncf %8 : vector<2x128xf32> to vector<2x128xbf16>
    %c0_6 = arith.constant 0 : index
    %c0_7 = arith.constant 0 : index
    %10 = vector.load %arg4[%c0_6, %c0_7] : memref<128x128xbf16, #tpu.memory_space<vmem>>, vector<128x128xbf16>
    %cst_8 = arith.constant dense<0.000000e+00> : vector<2x128xf32>
    %11 = tpu.matmul %9, %10, %cst_8 {dimension_numbers = #tpu.dot_dimension_numbers<[1], [0], [0], [1], [0, 0, 1, 1], [], []>} : vector<2x128xbf16>, vector<128x128xbf16>, vector<2x128xf32> -> vector<2x128xf32>
    %c0_9 = arith.constant 0 : index
    %c0_10 = arith.constant 0 : index
    %12 = vector.load %arg5[%c0_9, %c0_10] : memref<1x128xf32, #tpu.memory_space<vmem>>, vector<1x128xf32>
    %13 = vector.broadcast %12 : vector<1x128xf32> to vector<2x128xf32>
    %14 = arith.addf %11, %13 : vector<2x128xf32>
    %cst_11 = arith.constant 0.000000e+00 : f32
    %15 = vector.broadcast %cst_11 : f32 to vector<2x128xf32>
    %16 = arith.maximumf %14, %15 : vector<2x128xf32>
    %17 = arith.truncf %16 : vector<2x128xf32> to vector<2x128xbf16>
    %c0_12 = arith.constant 0 : index
    %c0_13 = arith.constant 0 : index
    %18 = vector.load %arg6[%c0_12, %c0_13] : memref<128x128xbf16, #tpu.memory_space<vmem>>, vector<128x128xbf16>
    %cst_14 = arith.constant dense<0.000000e+00> : vector<2x128xf32>
    %19 = tpu.matmul %17, %18, %cst_14 {dimension_numbers = #tpu.dot_dimension_numbers<[1], [0], [0], [1], [0, 0, 1, 1], [], []>} : vector<2x128xbf16>, vector<128x128xbf16>, vector<2x128xf32> -> vector<2x128xf32>
    %c0_15 = arith.constant 0 : index
    %c0_16 = arith.constant 0 : index
    %20 = vector.load %arg7[%c0_15, %c0_16] : memref<1x128xf32, #tpu.memory_space<vmem>>, vector<1x128xf32>
    %21 = vector.broadcast %20 : vector<1x128xf32> to vector<2x128xf32>
    %22 = arith.addf %19, %21 : vector<2x128xf32>
    %c0_17 = arith.constant 0 : index
    %c0_18 = arith.constant 0 : index
    %23 = vector.load %arg8[%c0_17, %c0_18] : memref<2x128xf32, #tpu.memory_space<vmem>>, vector<2x128xf32>
    tpu.vector_store %arg8[%c0_17, %c0_18], %22 {strides = array<i32>} : memref<2x128xf32, #tpu.memory_space<vmem>>, vector<2x128xf32>,
    return
  }
  func.func @transform_0(%arg0: i32) -> (i32, i32) {
    %c0_i32 = arith.constant 0 : i32
    %c0_i32_0 = arith.constant 0 : i32
    return %arg0, %c0_i32 : i32, i32
  }
  func.func @transform_1(%arg0: i32) -> (i32, i32) {
    %c0_i32 = arith.constant 0 : i32
    %c0_i32_0 = arith.constant 0 : i32
    %c0_i32_1 = arith.constant 0 : i32
    return %c0_i32, %c0_i32_0 : i32, i32
  }
  func.func @transform_2(%arg0: i32) -> (i32, i32) {
    %c0_i32 = arith.constant 0 : i32
    %c0_i32_0 = arith.constant 0 : i32
    %c0_i32_1 = arith.constant 0 : i32
    return %c0_i32, %c0_i32_0 : i32, i32
  }
  func.func @transform_3(%arg0: i32) -> (i32, i32) {
    %c0_i32 = arith.constant 0 : i32
    %c0_i32_0 = arith.constant 0 : i32
    %c0_i32_1 = arith.constant 0 : i32
    return %c0_i32, %c0_i32_0 : i32, i32
  }
  func.func @transform_4(%arg0: i32) -> (i32, i32) {
    %c0_i32 = arith.constant 0 : i32
    %c0_i32_0 = arith.constant 0 : i32
    %c0_i32_1 = arith.constant 0 : i32
    return %c0_i32, %c0_i32_0 : i32, i32
  }
  func.func @transform_5(%arg0: i32) -> (i32, i32) {
    %c0_i32 = arith.constant 0 : i32
    %c0_i32_0 = arith.constant 0 : i32
    %c0_i32_1 = arith.constant 0 : i32
    return %c0_i32, %c0_i32_0 : i32, i32
  }
  func.func @transform_6(%arg0: i32) -> (i32, i32) {
    %c0_i32 = arith.constant 0 : i32
    %c0_i32_0 = arith.constant 0 : i32
    %c0_i32_1 = arith.constant 0 : i32
    return %c0_i32, %c0_i32_0 : i32, i32
  }
  func.func @transform_7(%arg0: i32) -> (i32, i32) {
    %c0_i32 = arith.constant 0 : i32
    %c0_i32_0 = arith.constant 0 : i32
    return %arg0, %c0_i32 : i32, i32
  }
}

</mosaic_0001>

<bundles_post_ra>
// kernel: twonn_forward.1
= control target key start
LH: loop header
LB: loop body
LE: loop exit
PB: predicated region body
PF: predicated region fallthrough
CT: control target
= control target key end

     0   :  { %12 = vsyncpa [#allocation3], 0  ;;  %s1450_s0 = inlined_call_operand.vmem [shape: f32[2,1024], index: 0, kind: input, shape index: {}]   ;;  %s1451_s1 = inlined_call_operand.hbm [shape: bf16[1024,128], index: 1, kind: input, shape index: {}]   ;;  %s1452_s2 = inlined_call_operand.vmem [shape: f32[1,128], index: 2, kind: input, shape index: {}]   ;;  %s1453_s3 = inlined_call_operand.vmem [shape: bf16[128,128], index: 3, kind: input, shape index: {}]   ;;  %s1454_s4 = inlined_call_operand.vmem [shape: f32[1,128], index: 4, kind: input, shape index: {}]   ;;  %s1455_s5 = inlined_call_operand.vmem [shape: bf16[128,128], index: 5, kind: input, shape index: {}]   ;;  %s1456_s6 = inlined_call_operand.vmem [shape: f32[1,128], index: 6, kind: input, shape index: {}]   ;;  %s1457_s7 = inlined_call_operand.hbm [shape: f32[2,128], index: 7, kind: output, shape index: {}]  }
   0x1   :  { %13 = vsyncpa [#allocation4], 0  ;;  %s20_s26 = sshll.u32 %s1451_s1, 4  ;;  %s1337_s27 = smov [#allocation2]   ;;  %s21_s26 = int_to_ptr.hbm [resolvable:$true] %s20_s26 }
   0x2   :  { %s22_s28 = sshll.u32 %s1337_s27, 4  ;;  %s1338_s29 = smov 64   ;;  %s23_s28 = int_to_ptr.vmem [resolvable:$true] %s22_s28 }
   0x3   :  { %s1339_s30 = smov 4  }
   0x4   :  { %28 = dma.hbm_to_vmem [thread:$0]  %s21_s26, 8192, %s23_s28, [#allocation3], %s1338_s29, %s1338_s29, %s1339_s30  }
   0x5   :  { %1333 = dma.done.wait [#allocation3], 8192  }
   0x6   :  { %1334 = vsyncadd [#allocation3], 4294959104  ;;  %v1205_v0 = vld [vmem:[#allocation2 + $0x38] sm:$0xff]  ;;  %v1204_v4 = vld [vmem:[#allocation2 + $0x30] sm:$0xff]  ;;  %s1340_s21 = smov [#allocation5]  }
   0x7   :  { %v1213_v1 = vld [vmem:[#allocation2 + $0x78] sm:$0xff]  ;;  %590 = vmatpush.bf16.msra.mxu0 %v1205_v0  ;;  %v1212_v5 = vld [vmem:[#allocation2 + $0x70] sm:$0xff]  ;;  %v1203_v8 = vld [vmem:[#allocation2 + $0x28] sm:$0xff]  ;;  %s866_s22 = sshll.u32 %s1340_s21, 4  ;;  %s867_s22 = int_to_ptr.vmem [resolvable:$true] %s866_s22 }
   0x8   :  { %v1221_v2 = vld [vmem:[#allocation2 + $0xb8] sm:$0xff]  ;;  %603 = vmatpush.bf16.msra.mxu1 %v1213_v1  ;;  %v1220_v6 = vld [vmem:[#allocation2 + $0xb0] sm:$0xff]  ;;  %v1211_v9 = vld [vmem:[#allocation2 + $0x68] sm:$0xff] }
   0x9   :  { %v1229_v3 = vld [vmem:[#allocation2 + $0xf8] sm:$0xff]  ;;  %616 = vmatpush.bf16.msra.mxu2 %v1221_v2  ;;  %v1228_v7 = vld [vmem:[#allocation2 + $0xf0] sm:$0xff]  ;;  %v1219_v10 = vld [vmem:[#allocation2 + $0xa8] sm:$0xff] }
   0xa   :  { %629 = vmatpush.bf16.msra.mxu3 %v1229_v3  ;;  %v1227_v11 = vld [vmem:[#allocation2 + $0xe8] sm:$0xff]  ;;  %v1202_v12 = vld [vmem:[#allocation2 + $0x20] sm:$0xff]  ;;  %v43_v16 = vld [vmem:[%s1450_s0] sm:$0xff] }
   0xb   :  { %591 = vmatpush.bf16.msra.mxu0 %v1204_v4  ;;  %v1210_v13 = vld [vmem:[#allocation2 + $0x60] sm:$0xff]  ;;  %v1201_v17 = vld [vmem:[#allocation2 + $0x18] sm:$0xff]  ;;  %47 = vst [vmem:[#allocation1] ss:$4 sm:$0xff] %v43_v16  ;;  %v1200_v21 = vld [vmem:[#allocation2 + $0x10] sm:$0xff] }
   0xc   :  { %604 = vmatpush.bf16.msra.mxu1 %v1212_v5  ;;  %v1218_v14 = vld [vmem:[#allocation2 + $0xa0] sm:$0xff]  ;;  %v1209_v18 = vld [vmem:[#allocation2 + $0x58] sm:$0xff]  ;;  %v1208_v22 = vld [vmem:[#allocation2 + $0x50] sm:$0xff] }
   0xd   :  { %617 = vmatpush.bf16.msra.mxu2 %v1220_v6  ;;  %v1226_v15 = vld [vmem:[#allocation2 + $0xe0] sm:$0xff]  ;;  %v1217_v19 = vld [vmem:[#allocation2 + $0x98] sm:$0xff]  ;;  %v1216_v23 = vld [vmem:[#allocation2 + $0x90] sm:$0xff] }
   0xe   :  { %630 = vmatpush.bf16.msra.mxu3 %v1228_v7  ;;  %v1225_v20 = vld [vmem:[#allocation2 + $0xd8] sm:$0xff]  ;;  %v1224_v24 = vld [vmem:[#allocation2 + $0xd0] sm:$0xff]  ;;  %v1199_v25 = vld [vmem:[#allocation2 + $0x8] sm:$0xff] }
   0xf   :  { %592 = vmatpush.bf16.msra.mxu0 %v1203_v8  ;;  %v1207_v26 = vld [vmem:[#allocation2 + $0x48] sm:$0xff]  ;;  %v44_v29 = vld [vmem:[%s1450_s0 + $0x8] sm:$0xff]  ;;  %v1237_v34 = vld [vmem:[#allocation2 + $0x138] sm:$0xff] }
  0x10   :  { %605 = vmatpush.bf16.msra.mxu1 %v1211_v9  ;;  %v1215_v27 = vld [vmem:[#allocation2 + $0x88] sm:$0xff]  ;;  %v1198_v30 = vld [vmem:[#allocation2] sm:$0xff]  ;;  %49 = vst [vmem:[#allocation1 + $0x20] ss:$4 sm:$0xff] %v44_v29  ;;  %v1245_v35 = vld [vmem:[#allocation2 + $0x178] sm:$0xff] }
  0x11   :  { %618 = vmatpush.bf16.msra.mxu2 %v1219_v10  ;;  %v1223_v28 = vld [vmem:[#allocation2 + $0xc8] sm:$0xff]  ;;  %v1206_v31 = vld [vmem:[#allocation2 + $0x40] sm:$0xff]  ;;  %v1253_v40 = vld [vmem:[#allocation2 + $0x1b8] sm:$0xff] }
  0x12   :  { %631 = vmatpush.bf16.msra.mxu3 %v1227_v11  ;;  %v1214_v32 = vld [vmem:[#allocation2 + $0x80] sm:$0xff]  ;;  %v52_v36 = vld.sshfl [vmem:[#allocation1 + $0x10] sm:$0xff pattern:$0x73625140]  ;;  %v1261_v41 = vld [vmem:[#allocation2 + $0x1f8] sm:$0xff] }
  0x13   :  { %593 = vmatpush.bf16.msra.mxu0 %v1202_v12  ;;  %v1222_v33 = vld [vmem:[#allocation2 + $0xc0] sm:$0xff]  ;;  %v50_v37 = vld.sshfl [vmem:[#allocation1] sm:$0xff pattern:$0x73625140]  ;;  %v68_v42 = vpack.c.bf16 %v52_v36, %v52_v36  ;;  %v1236_v46 = vld [vmem:[#allocation2 + $0x130] sm:$0xff] }
  0x14   :  { %606 = vmatpush.bf16.msra.mxu1 %v1210_v13  ;;  %v53_v38 = vld.sshfl [vmem:[#allocation1 + $0x18] sm:$0xff pattern:$0x73625140]  ;;  %v51_v39 = vld.sshfl [vmem:[#allocation1 + $0x8] sm:$0xff pattern:$0x73625140]  ;;  %v66_v43 = vpack.c.bf16 %v50_v37, %v50_v37 }
  0x15   :  { %619 = vmatpush.bf16.msra.mxu2 %v1218_v14  ;;  %v69_v44 = vpack.c.bf16 %v53_v38, %v53_v38  ;;  %v67_v45 = vpack.c.bf16 %v51_v39, %v51_v39  ;;  %v1244_v47 = vld [vmem:[#allocation2 + $0x170] sm:$0xff]  ;;  %v1235_v50 = vld [vmem:[#allocation2 + $0x128] sm:$0xff]  ;;  %v1234_v54 = vld [vmem:[#allocation2 + $0x120] sm:$0xff] }
  0x16   :  { %632 = vmatpush.bf16.msra.mxu3 %v1226_v15  ;;  %v1252_v48 = vld [vmem:[#allocation2 + $0x1b0] sm:$0xff]  ;;  %v1243_v51 = vld [vmem:[#allocation2 + $0x168] sm:$0xff]  ;;  %v1242_v55 = vld [vmem:[#allocation2 + $0x160] sm:$0xff] }
  0x17   :  { %594 = vmatpush.bf16.msra.mxu0 %v1201_v17  ;;  %v1260_v49 = vld [vmem:[#allocation2 + $0x1f0] sm:$0xff]  ;;  %v1251_v52 = vld [vmem:[#allocation2 + $0x1a8] sm:$0xff]  ;;  %v1250_v56 = vld [vmem:[#allocation2 + $0x1a0] sm:$0xff] }
  0x18   :  { %607 = vmatpush.bf16.msra.mxu1 %v1209_v18  ;;  %v1259_v53 = vld [vmem:[#allocation2 + $0x1e8] sm:$0xff]  ;;  %v1258_v57 = vld [vmem:[#allocation2 + $0x1e0] sm:$0xff]  ;;  %v1233_v58 = vld [vmem:[#allocation2 + $0x118] sm:$0xff] }
  0x19   :  { %620 = vmatpush.bf16.msra.mxu2 %v1217_v19  ;;  %v1241_v59 = vld [vmem:[#allocation2 + $0x158] sm:$0xff]  ;;  %v1232_v62 = vld [vmem:[#allocation2 + $0x110] sm:$0xff]  ;;  %v1231_v2 = vld [vmem:[#allocation2 + $0x108] sm:$0xff] }
  0x1a   :  { %633 = vmatpush.bf16.msra.mxu3 %v1225_v20  ;;  %v1249_v60 = vld [vmem:[#allocation2 + $0x198] sm:$0xff]  ;;  %v1240_v63 = vld [vmem:[#allocation2 + $0x150] sm:$0xff]  ;;  %v1239_v3 = vld [vmem:[#allocation2 + $0x148] sm:$0xff] }
  0x1b   :  { %595 = vmatpush.bf16.msra.mxu0 %v1200_v21  ;;  %v1257_v61 = vld [vmem:[#allocation2 + $0x1d8] sm:$0xff]  ;;  %v1248_v0 = vld [vmem:[#allocation2 + $0x190] sm:$0xff]  ;;  %v1247_v4 = vld [vmem:[#allocation2 + $0x188] sm:$0xff] }
  0x1c   :  { %608 = vmatpush.bf16.msra.mxu1 %v1208_v22  ;;  %v1256_v1 = vld [vmem:[#allocation2 + $0x1d0] sm:$0xff]  ;;  %v1255_v5 = vld [vmem:[#allocation2 + $0x1c8] sm:$0xff]  ;;  %v1230_v6 = vld [vmem:[#allocation2 + $0x100] sm:$0xff] }
  0x1d   :  { %621 = vmatpush.bf16.msra.mxu2 %v1216_v23  ;;  %v1238_v7 = vld [vmem:[#allocation2 + $0x140] sm:$0xff]  ;;  %v54_v10 = vld.sshfl [vmem:[#allocation1 + $0x20] sm:$0xff pattern:$0x73625140]  ;;  %v1269_v18 = vld [vmem:[%s1453_s3 + $0x38] sm:$0xff] }
  0x1e   :  { %634 = vmatpush.bf16.msra.mxu3 %v1224_v24  ;;  %v1246_v8 = vld [vmem:[#allocation2 + $0x180] sm:$0xff]  ;;  %v56_v12 = vld.sshfl [vmem:[#allocation1 + $0x30] sm:$0xff pattern:$0x73625140]  ;;  %v70_v14 = vpack.c.bf16 %v54_v10, %v54_v10  ;;  %v1266_v21 = vld [vmem:[%s1453_s3 + $0x20] sm:$0xff] }
  0x1f   :  { %596 = vmatpush.bf16.msra.mxu0 %v1199_v25  ;;  %v1254_v9 = vld [vmem:[#allocation2 + $0x1c0] sm:$0xff]  ;;  %v57_v13 = vld.sshfl [vmem:[#allocation1 + $0x38] sm:$0xff pattern:$0x73625140]  ;;  %v72_v16 = vpack.c.bf16 %v56_v12, %v56_v12  ;;  %v1268_v19 = vld [vmem:[%s1453_s3 + $0x30] sm:$0xff] }
  0x20   :  { %609 = vmatpush.bf16.msra.mxu1 %v1207_v26  ;;  %v55_v11 = vld.sshfl [vmem:[#allocation1 + $0x28] sm:$0xff pattern:$0x73625140]  ;;  %v73_v17 = vpack.c.bf16 %v57_v13, %v57_v13  ;;  %v1265_v22 = vld [vmem:[%s1453_s3 + $0x18] sm:$0xff]  ;;  %v1264_v24 = vld [vmem:[%s1453_s3 + $0x10] sm:$0xff] }
  0x21   :  { %622 = vmatpush.bf16.msra.mxu2 %v1215_v27  ;;  %v71_v15 = vpack.c.bf16 %v55_v11, %v55_v11  ;;  %v1267_v20 = vld [vmem:[%s1453_s3 + $0x28] sm:$0xff]  ;;  %v1276_v36 = vld [vmem:[%s1455_s5 + $0x30] sm:$0xff] }
  0x22   :  { %635 = vmatpush.bf16.msra.mxu3 %v1223_v28  ;;  %v1263_v26 = vld [vmem:[%s1453_s3 + $0x8] sm:$0xff] }
  0x23   :  { %597 = vmatpush.bf16.msra.mxu0 %v1198_v30  ;;  %v1262_v30 = vld [vmem:[%s1453_s3] sm:$0xff]  ;;  %v1275_v38 = vld [vmem:[%s1455_s5 + $0x28] sm:$0xff] }
  0x24   :  { %610 = vmatpush.bf16.msra.mxu1 %v1206_v31 }
  0x25   :  { %623 = vmatpush.bf16.msra.mxu2 %v1214_v32  ;;  %v1282_v32 = vld [vmem:[%s1452_s2] ss:$0 sm:$0xff] }
  0x26   :  { %636 = vmatpush.bf16.msra.mxu3 %v1222_v33  ;;  %598 = vmatmul.bf16.vlgmr.msra.gmra.mxu0 %v66_v43  ;;  %v1277_v33 = vld [vmem:[%s1455_s5 + $0x38] sm:$0xff] }
  0x27   :  { %642 = vmatpush.bf16.msrb.mxu0 %v1237_v34  ;;  %611 = vmatmul.bf16.vlgmr.msra.gmra.mxu1 %v67_v45 }
  0x28   :  { %655 = vmatpush.bf16.msrb.mxu1 %v1245_v35  ;;  %624 = vmatmul.bf16.vlgmr.msra.gmra.mxu2 %v68_v42  ;;  %v1273_v42 = vld [vmem:[%s1455_s5 + $0x18] sm:$0xff] }
  0x29   :  { %668 = vmatpush.bf16.msrb.mxu2 %v1253_v40  ;;  %637 = vmatmul.bf16.vlgmr.msra.gmra.mxu3 %v69_v44  ;;  %v1274_v40 = vld [vmem:[%s1455_s5 + $0x20] sm:$0xff] }
  0x2a   :  { %681 = vmatpush.bf16.msrb.mxu3 %v1261_v41 }
  0x2b   :  { %643 = vmatpush.bf16.msrb.mxu0 %v1236_v46 }
  0x2c   :  { %656 = vmatpush.bf16.msrb.mxu1 %v1244_v47  ;;  %v1272_v47 = vld [vmem:[%s1455_s5 + $0x10] sm:$0xff] }
  0x2d   :  { %669 = vmatpush.bf16.msrb.mxu2 %v1252_v48 }
  0x2e   :  { %682 = vmatpush.bf16.msrb.mxu3 %v1260_v49 }
  0x2f   :  { %644 = vmatpush.bf16.msrb.mxu0 %v1235_v50 }
  0x30   :  { %657 = vmatpush.bf16.msrb.mxu1 %v1243_v51 }
  0x31   :  { %670 = vmatpush.bf16.msrb.mxu2 %v1251_v52 }
  0x32   :  { %683 = vmatpush.bf16.msrb.mxu3 %v1259_v53 }
  0x33   :  { %645 = vmatpush.bf16.msrb.mxu0 %v1234_v54 }
  0x34   :  { %658 = vmatpush.bf16.msrb.mxu1 %v1242_v55 }
  0x35   :  { %671 = vmatpush.bf16.msrb.mxu2 %v1250_v56 }
  0x36   :  { %684 = vmatpush.bf16.msrb.mxu3 %v1258_v57 }
  0x37   :  { %646 = vmatpush.bf16.msrb.mxu0 %v1233_v58 }
  0x38   :  { %659 = vmatpush.bf16.msrb.mxu1 %v1241_v59  ;;  %v1271_v59 = vld [vmem:[%s1455_s5 + $0x8] sm:$0xff] }
  0x39   :  { %672 = vmatpush.bf16.msrb.mxu2 %v1249_v60  ;;  %v1270_v60 = vld [vmem:[%s1455_s5] sm:$0xff]  ;;  %s868_s5 = sshll.u32 %s1457_s7, 4  ;;  %s869_s5 = int_to_ptr.hbm [resolvable:$true] %s868_s5 }
  0x3a   :  { %685 = vmatpush.bf16.msrb.mxu3 %v1257_v61  ;;  %v1283_v61 = vld [vmem:[%s1454_s4] ss:$0 sm:$0xff] }
  0x3b   :  { %647 = vmatpush.bf16.msrb.mxu0 %v1232_v62 }
  0x3c   :  { %660 = vmatpush.bf16.msrb.mxu1 %v1240_v63 }
  0x3d   :  { %673 = vmatpush.bf16.msrb.mxu2 %v1248_v0 }
  0x3e   :  { %686 = vmatpush.bf16.msrb.mxu3 %v1256_v1 }
  0x3f   :  { %648 = vmatpush.bf16.msrb.mxu0 %v1231_v2 }
  0x40   :  { %661 = vmatpush.bf16.msrb.mxu1 %v1239_v3  ;;  %v1284_v3 = vld [vmem:[%s1456_s6] ss:$0 sm:$0xff] }
  0x41   :  { %674 = vmatpush.bf16.msrb.mxu2 %v1247_v4 }
  0x42   :  { %687 = vmatpush.bf16.msrb.mxu3 %v1255_v5 }
  0x43   :  { %649 = vmatpush.bf16.msrb.mxu0 %v1230_v6 }
  0x44   :  { %662 = vmatpush.bf16.msrb.mxu1 %v1238_v7 }
  0x45   :  { %675 = vmatpush.bf16.msrb.mxu2 %v1246_v8 }
  0x46   :  { %688 = vmatpush.bf16.msrb.mxu3 %v1254_v9  ;;  %650 = vmatmul.bf16.vlgmr.msrb.gmra.mxu0 %v70_v14 }
  0x47   :  { %663 = vmatmul.bf16.vlgmr.msrb.gmra.mxu1 %v71_v15  ;;  %764 = vmatpush.bf16.msra.mxu0 %v1269_v18 }
  0x48   :  { %676 = vmatmul.bf16.vlgmr.msrb.gmra.mxu2 %v72_v16  ;;  %847 = vmatpush.bf16.msra.mxu1 %v1277_v33 }
  0x49   :  { %689 = vmatmul.bf16.vlgmr.msrb.gmra.mxu3 %v73_v17 }
  0x4b   :  { %765 = vmatpush.bf16.msra.mxu0 %v1268_v19 }
  0x4c   :  { %848 = vmatpush.bf16.msra.mxu1 %v1276_v36 }
  0x4f   :  { %766 = vmatpush.bf16.msra.mxu0 %v1267_v20 }
  0x50   :  { %849 = vmatpush.bf16.msra.mxu1 %v1275_v38 }
  0x53   :  { %767 = vmatpush.bf16.msra.mxu0 %v1266_v21 }
  0x54   :  { %850 = vmatpush.bf16.msra.mxu1 %v1274_v40 }
  0x57   :  { %768 = vmatpush.bf16.msra.mxu0 %v1265_v22 }
  0x58   :  { %851 = vmatpush.bf16.msra.mxu1 %v1273_v42 }
  0x5b   :  { %769 = vmatpush.bf16.msra.mxu0 %v1264_v24 }
  0x5c   :  { %852 = vmatpush.bf16.msra.mxu1 %v1272_v47 }
  0x5f   :  { %770 = vmatpush.bf16.msra.mxu0 %v1263_v26 }
  0x60   :  { %853 = vmatpush.bf16.msra.mxu1 %v1271_v59 }
  0x63   :  { %771 = vmatpush.bf16.msra.mxu0 %v1262_v30 }
  0x64   :  { %854 = vmatpush.bf16.msra.mxu1 %v1270_v60 }
  0xa3   :  { %v599_v23 = vpop.f32.mrf.mxu0 }
  0xa4   :  { %v612_v25 = vpop.f32.mrf.mxu1  ;;  %v600_v37 = vadd.f32 %v1282_v32, %v599_v23 }
  0xa6   :  { %v613_v39 = vadd.f32 %v612_v25, %v600_v37 }
  0xab   :  { %v625_v27 = vpop.f32.mrf.mxu2  ;;  %v601_v29 = vpop.f32.mrf.mxu0 }
  0xac   :  { %v638_v28 = vpop.f32.mrf.mxu3  ;;  %v614_v31 = vpop.f32.mrf.mxu1  ;;  %v626_v41 = vadd.f32 %v625_v27, %v613_v39 }
  0xae   :  { %v639_v43 = vadd.f32 %v638_v28, %v626_v41 }
  0xb3   :  { %v627_v34 = vpop.f32.mrf.mxu2 }
  0xb4   :  { %v640_v35 = vpop.f32.mrf.mxu3 }
  0xc3   :  { %v651_v44 = vpop.f32.mrf.mxu0 }
  0xc4   :  { %v664_v45 = vpop.f32.mrf.mxu1  ;;  %v652_v46 = vadd.f32 %v651_v44, %v639_v43 }
  0xc6   :  { %v665_v48 = vadd.f32 %v664_v45, %v652_v46 }
  0xcb   :  { %v677_v49 = vpop.f32.mrf.mxu2  ;;  %v653_v52 = vpop.f32.mrf.mxu0 }
  0xcc   :  { %v690_v50 = vpop.f32.mrf.mxu3  ;;  %v678_v51 = vadd.f32 %v677_v49, %v665_v48  ;;  %v666_v53 = vpop.f32.mrf.mxu1 }
  0xce   :  { %v691_v54 = vadd.f32 %v690_v50, %v678_v51 }
  0xd0   :  { %v694_v55 = vmax.f32 %v691_v54, 0.0 }
  0xd2   :  { %v695_v56 = vpack.c.bf16 %v694_v55, %v694_v55 }
  0xd3   :  { %v679_v57 = vpop.f32.mrf.mxu2 }
  0xd4   :  { %v692_v58 = vpop.f32.mrf.mxu3  ;;  %772 = vmatmul.bf16.vlgmr.msra.gmra.mxu0 %v695_v56 }
 0x151   :  { %v773_v62 = vpop.f32.mrf.mxu0 }
 0x152   :  { %v774_v63 = vadd.f32 %v1283_v61, %v773_v62 }
 0x154   :  { %v777_v0 = vmax.f32 %v774_v63, 0.0 }
 0x156   :  { %v778_v1 = vpack.c.bf16 %v777_v0, %v777_v0 }
 0x158   :  { %855 = vmatmul.bf16.vlgmr.msra.gmra.mxu1 %v778_v1 }
 0x159   :  { %v775_v2 = vpop.f32.mrf.mxu0 }
 0x1d5   :  { %v856_v4 = vpop.f32.mrf.mxu1 }
 0x1d6   :  { %v857_v5 = vadd.f32 %v1284_v3, %v856_v4 }
 0x1d8   :  { %860 = vst [vmem:[#allocation5] sm:$0x3] %v857_v5 }
 0x1d9   :  { %871 = dma.vmem_to_hbm [thread:$0]  %s867_s22, 32, %s869_s5, [#allocation4]  }
 0x1dd   :  { %v858_v6 = vpop.f32.mrf.mxu1 }
 0x1de   :  { %1335 = dma.done.wait [#allocation4], 32  }
 0x1df   :  { %1336 = vsyncadd [#allocation4], 4294967264 }
 0x1e0   :  { %876 = vsyncpa [#allocation3], 1 }
 0x1e1   :  { %877 = vsyncpa [#allocation4], 1 }

</bundles_post_ra>
